<compile_context>
chip_gen: v7x
topology: tpu7x:2x2x1
jax: 0.10.0
libtpu: 0.0.40
codegen_flags: <defaults>
</compile_context>

<pallas_src>
import functools

import jax
import jax.numpy as jnp
from jax.experimental import pallas as pl
from jax.experimental.pallas import tpu as pltpu

ALPHA = 1.0          # == 1, folded away
GAMMA = 2            # implemented as an explicit square (no float pow)
LANES = 128
TR_MAX = 2048        # rows per grid step (f32: 2 inputs x 2 bufs x 1 MiB = 4 MiB VMEM)

_SUBLANE = {4: 8, 2: 16, 1: 32}   # min sublane multiple per dtype itemsize


def _num_slices():
    """Size of the leading 'parallel' grid axis: TensorCores per device."""
    try:
        kind = jax.devices()[0].device_kind.lower()
    except Exception:
        return 1
    # v7x has 2 TCs per device; megacore v4/v5p also exposes 2. v5e/v6e have 1.
    return 2 if any(v in kind for v in ("v7", "v4", "v5p")) else 1


def _fold(v, tr):
    # (tr, 128) -> (8, 128): whole-vreg elementwise adds on the VALU (no cross-lane XLU).
    return jnp.sum(v.reshape(tr // 8, 8, LANES), axis=0)


def _elementwise(x, t, binary_targets, recip):
    """Per-element p = sigmoid(x), t as f32, and the focal term.

    Matches PyTorch sigmoid -> binary_cross_entropy (log clamped at -100) ->
    exp(-bce) focal, but with numerically-stable logs (log-sigmoid from one
    softplus(-|x|)) so only 3 transcendentals/element are needed.
    """
    x = x.astype(jnp.float32)
    t = t.astype(jnp.float32)
    e = jnp.exp(-jnp.abs(x))                  # in (0, 1]: never overflows
    sp = jnp.log1p(e)                         # softplus(-|x|)
    r = recip(1.0 + e)                        # 1 / (1 + exp(-|x|))
    p = jnp.where(x >= 0.0, r, 1.0 - r)       # sigmoid(x)
    log_p = jnp.maximum(jnp.minimum(x, 0.0) - sp, -100.0)           # log(p)
    # log(1-p) = -max(x,0) - softplus(-|x|). Once sigmoid rounds to 1.0 PyTorch's
    # BCE hits its -100 log clamp; the where() gate reproduces that behaviour.
    log_1mp = jnp.where(p >= 1.0, -100.0,
                        jnp.maximum(-jnp.maximum(x, 0.0) - sp, -100.0))
    bce = -(t * (log_p - log_1mp) + log_1mp)
    if binary_targets:
        # == exp(-bce) for t in {0,1} (up to exp(-100) vs 0 where the clamp fires)
        pt = t * p + (1.0 - t) * (1.0 - p)
    else:
        pt = jnp.exp(-bce)
    one_m_pt = 1.0 - pt
    focal = (one_m_pt * one_m_pt) * bce       # alpha == 1, gamma == 2 -> square
    return p, t, focal


def _dice_focal_kernel(x_ref, t_ref, o_ref, acc_ref, *, tr, steps, binary_targets):
    s = pl.program_id(1)                      # step within this slice (reduction axis)

    @pl.when(s == 0)
    def _():
        acc_ref[...] = jnp.zeros_like(acc_ref)

    p, t, focal = _elementwise(x_ref[...], t_ref[...], binary_targets,
                               lambda v: pl.reciprocal(v, approx=False))

    acc_ref[0] += _fold(p * t, tr)            # sum(p * t)
    acc_ref[1] += _fold(p, tr)                # sum(p)
    acc_ref[2] += _fold(t, tr)                # sum(t)
    acc_ref[3] += _fold(focal, tr)            # sum(focal)

    @pl.when(s == steps - 1)
    def _():
        o_ref[...] = acc_ref[...]


def _sum4(p, t, focal):
    return jnp.stack([jnp.sum(p * t), jnp.sum(p), jnp.sum(t), jnp.sum(focal)])


def dice_focal_loss(inputs, targets, smooth=1.0, *, assume_binary_targets=True):
    """Matches DiceFocalLoss.forward(inputs, targets, smooth).

    Set assume_binary_targets=False for soft (non-{0,1}) targets; the default
    uses the pt = t*p + (1-t)*(1-p) fast path, removing one exp per element.
    """
    n = inputs.size
    x = inputs.reshape(-1)
    t = targets.reshape(-1)
    if t.dtype == jnp.bool_:
        t = t.astype(jnp.int8)   # bool VMEM blocks are awkward; int8 streams fine

    num_slices = _num_slices()
    subm = max(_SUBLANE.get(jnp.dtype(x.dtype).itemsize, 32),
               _SUBLANE.get(jnp.dtype(t.dtype).itemsize, 32))

    rows_full = n // LANES
    groups = (rows_full // subm) // num_slices          # subm-row groups per slice
    if groups == 0 and num_slices > 1:
        num_slices = 1
        groups = rows_full // subm

    kernel_sums = jnp.zeros((4,), jnp.float32)
    n_main = 0
    if groups > 0:
        gmax = max(TR_MAX // subm, 1)
        steps = pl.cdiv(groups, gmax)                   # per-slice grid steps
        tr = (groups // steps) * subm                   # rows per block (<= TR_MAX)
        rows_main = num_slices * steps * tr
        n_main = rows_main * LANES

        # Zero-copy when n is block-aligned (common conv-feature-map case); otherwise
        # an offset-0 contiguous prefix slice (XLA may bitcast it; even as a copy it
        # never exceeds the old whole-array pad cost and the tail stays tiny).
        x_main = x if n_main == n else x[:n_main]
        t_main = t if n_main == n else t[:n_main]
        x2 = x_main.reshape(rows_main, LANES)
        t2 = t_main.reshape(rows_main, LANES)

        kernel = functools.partial(_dice_focal_kernel, tr=tr, steps=steps,
                                   binary_targets=assume_binary_targets)
        partials = pl.pallas_call(
            kernel,
            out_shape=jax.ShapeDtypeStruct((num_slices, 4, 8, LANES), jnp.float32),
            grid_spec=pltpu.PrefetchScalarGridSpec(
                num_scalar_prefetch=0,
                grid=(num_slices, steps),
                in_specs=[
                    pl.BlockSpec((tr, LANES), lambda pc, s: (pc * steps + s, 0)),
                    pl.BlockSpec((tr, LANES), lambda pc, s: (pc * steps + s, 0)),
                ],
                out_specs=pl.BlockSpec((None, 4, 8, LANES),
                                       lambda pc, s: (pc, 0, 0, 0)),
                scratch_shapes=[pltpu.VMEM((4, 8, LANES), jnp.float32)],
            ),
            compiler_params=pltpu.CompilerParams(
                # TODO(synk): verify on v7x (xprof) that the leading axis actually
                # shards across both TensorCores; switch to pltpu.CORE_PARALLEL if not.
                dimension_semantics=("parallel", "arbitrary"),
                vmem_limit_bytes=48 * 1024 * 1024,
            ),
        )(x2, t2)
        kernel_sums = jnp.sum(partials, axis=(0, 2, 3))  # (4,)

    if n_main < n:
        # Ragged remainder (at most steps*subm rows + 127 elements): plain-JAX epilogue.
        p_t, t_t, f_t = _elementwise(x[n_main:], t[n_main:],
                                     assume_binary_targets, lambda v: 1.0 / v)
        sums = kernel_sums + _sum4(p_t, t_t, f_t)
    else:
        sums = kernel_sums

    s_pt, s_p, s_t, s_f = sums[0], sums[1], sums[2], sums[3]
    dice_loss = 1.0 - (2.0 * s_pt + smooth) / (s_p + s_t + smooth)
    focal_mean = s_f / jnp.float32(n)
    return focal_mean + dice_loss


def _reference(inputs, targets, smooth=1.0):
    # PyTorch-faithful reference: sigmoid -> BCE on probabilities (log clamped at -100).
    p = jax.nn.sigmoid(inputs.astype(jnp.float32)).reshape(-1)
    t = targets.astype(jnp.float32).reshape(-1)
    intersection = jnp.sum(p * t)
    dice = 1.0 - (2.0 * intersection + smooth) / (jnp.sum(p) + jnp.sum(t) + smooth)
    log_p = jnp.maximum(jnp.log(p), -100.0)
    log_1mp = jnp.maximum(jnp.log(1.0 - p), -100.0)
    bce = -(t * log_p + (1.0 - t) * log_1mp)
    pt = jnp.exp(-bce)
    focal = jnp.mean(ALPHA * (1.0 - pt) ** GAMMA * bce)
    return focal + dice


if __name__ == "__main__":
    key = jax.random.PRNGKey(0)
    k1, k2, k3, k4, k5, k6 = jax.random.split(key, 6)

    # logits + binary targets — (B, C, H, W) = (2, 4, 16, 16); 2048 elems -> zero-copy path
    x = jax.random.normal(k1, (2, 4, 16, 16), dtype=jnp.float32)
    t = (jax.random.uniform(k2, (2, 4, 16, 16)) > 0.5).astype(jnp.float32)
    loss = jax.block_until_ready(dice_focal_loss(x, t, smooth=1.0))
    ref = jax.block_until_ready(_reference(x, t, smooth=1.0))
    assert jnp.allclose(loss, ref, rtol=1e-5, atol=1e-5), (loss, ref)

    # ragged element count — exercises the aligned-prefix kernel + plain-JAX tail epilogue
    x2 = jax.random.normal(k3, (3, 5, 37, 23), dtype=jnp.float32)
    t2 = (jax.random.uniform(k4, (3, 5, 37, 23)) > 0.5).astype(jnp.float32)
    loss2 = jax.block_until_ready(dice_focal_loss(x2, t2, smooth=1.0))
    ref2 = jax.block_until_ready(_reference(x2, t2, smooth=1.0))
    assert jnp.allclose(loss2, ref2, rtol=1e-5, atol=1e-5), (loss2, ref2)

    # soft (non-binary) targets — exercises the general pt = exp(-bce) path
    x3 = jax.random.normal(k5, (2, 4, 16, 16), dtype=jnp.float32)
    t3 = jax.random.uniform(k6, (2, 4, 16, 16), dtype=jnp.float32)
    loss3 = jax.block_until_ready(
        dice_focal_loss(x3, t3, smooth=1.0, assume_binary_targets=False))
    ref3 = jax.block_until_ready(_reference(x3, t3, smooth=1.0))
    assert jnp.allclose(loss3, ref3, rtol=1e-5, atol=1e-5), (loss3, ref3)

    print("KERNEL_OK")
</pallas_src>

<mosaic_0001>
module attributes {stable_mosaic.version = 11 : i64} {
  func.func @_dice_focal_kernel(%arg0: i32, %arg1: i32, %arg2: memref<16x128xf32, #tpu.memory_space<vmem>>, %arg3: memref<16x128xf32, #tpu.memory_space<vmem>>, %arg4: memref<1x4x8x128xf32, #tpu.memory_space<vmem>>, %arg5: memref<4x8x128xf32, #tpu.memory_space<vmem>>) attributes {dimension_semantics = [#tpu.dimension_semantics<parallel>, #tpu.dimension_semantics<arbitrary>], iteration_bounds = array<i64: 1, 1>, scalar_prefetch = 0 : i64, scratch_operands = 1 : i64, tpu.core_type = #tpu.core_type<tc>, window_params = [{transform_indices = @transform_0, window_bounds = array<i64: 16, 128>}, {transform_indices = @transform_1, window_bounds = array<i64: 16, 128>}, {transform_indices = @transform_2, window_bounds = array<i64: 1, 4, 8, 128>}]} {
    %c0_i32 = arith.constant 0 : i32
    %0 = arith.cmpi eq, %arg1, %c0_i32 : i32
    %1 = arith.extui %0 : i1 to i32
    %c0_i32_0 = arith.constant 0 : i32
    %2 = arith.cmpi ne, %1, %c0_i32_0 : i32
    scf.if %2 {
      %cst_45 = arith.constant 0.000000e+00 : f32
      %86 = vector.broadcast %cst_45 : f32 to vector<4x8x128xf32>
      %c0_46 = arith.constant 0 : index
      %c0_47 = arith.constant 0 : index
      %c0_48 = arith.constant 0 : index
      %87 = vector.load %arg5[%c0_46, %c0_47, %c0_48] : memref<4x8x128xf32, #tpu.memory_space<vmem>>, vector<4x8x128xf32>
      tpu.vector_store %arg5[%c0_46, %c0_47, %c0_48], %86 {strides = array<i32>} : memref<4x8x128xf32, #tpu.memory_space<vmem>>, vector<4x8x128xf32>,
    } else {
    }
    %c0 = arith.constant 0 : index
    %c0_1 = arith.constant 0 : index
    %3 = vector.load %arg2[%c0, %c0_1] : memref<16x128xf32, #tpu.memory_space<vmem>>, vector<16x128xf32>
    %c0_2 = arith.constant 0 : index
    %c0_3 = arith.constant 0 : index
    %4 = vector.load %arg3[%c0_2, %c0_3] : memref<16x128xf32, #tpu.memory_space<vmem>>, vector<16x128xf32>
    %5 = math.absf %3 : vector<16x128xf32>
    %cst = arith.constant 0.000000e+00 : f32
    %6 = vector.broadcast %cst : f32 to vector<16x128xf32>
    %7 = arith.subf %6, %5 : vector<16x128xf32>
    %8 = math.exp %7 : vector<16x128xf32>
    %9 = math.log1p %8 : vector<16x128xf32>
    %cst_4 = arith.constant 1.000000e+00 : f32
    %10 = vector.broadcast %cst_4 : f32 to vector<16x128xf32>
    %11 = arith.addf %10, %8 : vector<16x128xf32>
    %12 = tpu.reciprocal %11 : vector<16x128xf32> -> vector<16x128xf32>
    %cst_5 = arith.constant 0.000000e+00 : f32
    %13 = vector.broadcast %cst_5 : f32 to vector<16x128xf32>
    %14 = arith.cmpf oge, %3, %13 : vector<16x128xf32>
    %cst_6 = arith.constant 1.000000e+00 : f32
    %15 = vector.broadcast %cst_6 : f32 to vector<16x128xf32>
    %16 = arith.subf %15, %12 : vector<16x128xf32>
    %17 = arith.select %14, %12, %16 : vector<16x128xi1>, vector<16x128xf32>
    %cst_7 = arith.constant 0.000000e+00 : f32
    %18 = vector.broadcast %cst_7 : f32 to vector<16x128xf32>
    %19 = arith.minimumf %3, %18 : vector<16x128xf32>
    %20 = arith.subf %19, %9 : vector<16x128xf32>
    %cst_8 = arith.constant -1.000000e+02 : f32
    %21 = vector.broadcast %cst_8 : f32 to vector<16x128xf32>
    %22 = arith.maximumf %20, %21 : vector<16x128xf32>
    %cst_9 = arith.constant 1.000000e+00 : f32
    %23 = vector.broadcast %cst_9 : f32 to vector<16x128xf32>
    %24 = arith.cmpf oge, %17, %23 : vector<16x128xf32>
    %cst_10 = arith.constant 0.000000e+00 : f32
    %25 = vector.broadcast %cst_10 : f32 to vector<16x128xf32>
    %26 = arith.maximumf %3, %25 : vector<16x128xf32>
    %cst_11 = arith.constant 0.000000e+00 : f32
    %27 = vector.broadcast %cst_11 : f32 to vector<16x128xf32>
    %28 = arith.subf %27, %26 : vector<16x128xf32>
    %29 = arith.subf %28, %9 : vector<16x128xf32>
    %cst_12 = arith.constant -1.000000e+02 : f32
    %30 = vector.broadcast %cst_12 : f32 to vector<16x128xf32>
    %31 = arith.maximumf %29, %30 : vector<16x128xf32>
    %cst_13 = arith.constant -1.000000e+02 : f32
    %32 = vector.broadcast %cst_13 : f32 to vector<16x128xf32>
    %33 = arith.select %24, %32, %31 : vector<16x128xi1>, vector<16x128xf32>
    %34 = arith.subf %22, %33 : vector<16x128xf32>
    %35 = arith.mulf %4, %34 : vector<16x128xf32>
    %36 = arith.addf %35, %33 : vector<16x128xf32>
    %cst_14 = arith.constant 0.000000e+00 : f32
    %37 = vector.broadcast %cst_14 : f32 to vector<16x128xf32>
    %38 = arith.subf %37, %36 : vector<16x128xf32>
    %39 = arith.mulf %4, %17 : vector<16x128xf32>
    %cst_15 = arith.constant 1.000000e+00 : f32
    %40 = vector.broadcast %cst_15 : f32 to vector<16x128xf32>
    %41 = arith.subf %40, %4 : vector<16x128xf32>
    %cst_16 = arith.constant 1.000000e+00 : f32
    %42 = vector.broadcast %cst_16 : f32 to vector<16x128xf32>
    %43 = arith.subf %42, %17 : vector<16x128xf32>
    %44 = arith.mulf %41, %43 : vector<16x128xf32>
    %45 = arith.addf %39, %44 : vector<16x128xf32>
    %cst_17 = arith.constant 1.000000e+00 : f32
    %46 = vector.broadcast %cst_17 : f32 to vector<16x128xf32>
    %47 = arith.subf %46, %45 : vector<16x128xf32>
    %48 = arith.mulf %47, %47 : vector<16x128xf32>
    %49 = arith.mulf %48, %38 : vector<16x128xf32>
    %c0_18 = arith.constant 0 : index
    %c0_19 = arith.constant 0 : index
    %c0_20 = arith.constant 0 : index
    %50 = vector.load %arg5[%c0_18, %c0_19, %c0_20] : memref<4x8x128xf32, #tpu.memory_space<vmem>>, vector<1x8x128xf32>
    %51 = vector.shape_cast %50 : vector<1x8x128xf32> to vector<8x128xf32>
    %52 = arith.mulf %17, %4 : vector<16x128xf32>
    %53 = vector.shape_cast %52 : vector<16x128xf32> to vector<2x8x128xf32>
    %cst_21 = arith.constant dense<0.000000e+00> : vector<8x128xf32>
    %54 = vector.multi_reduction <add>, %53, %cst_21 [0] : vector<2x8x128xf32> to vector<8x128xf32>
    %55 = arith.addf %51, %54 : vector<8x128xf32>
    %c0_22 = arith.constant 0 : index
    %c0_23 = arith.constant 0 : index
    %c0_24 = arith.constant 0 : index
    %56 = vector.load %arg5[%c0_22, %c0_23, %c0_24] : memref<4x8x128xf32, #tpu.memory_space<vmem>>, vector<1x8x128xf32>
    %57 = vector.shape_cast %56 : vector<1x8x128xf32> to vector<8x128xf32>
    %58 = vector.shape_cast %55 : vector<8x128xf32> to vector<1x8x128xf32>
    tpu.vector_store %arg5[%c0_22, %c0_23, %c0_24], %58 {strides = array<i32>} : memref<4x8x128xf32, #tpu.memory_space<vmem>>, vector<1x8x128xf32>,
    %c1 = arith.constant 1 : index
    %c0_25 = arith.constant 0 : index
    %c0_26 = arith.constant 0 : index
    %59 = vector.load %arg5[%c1, %c0_25, %c0_26] : memref<4x8x128xf32, #tpu.memory_space<vmem>>, vector<1x8x128xf32>
    %60 = vector.shape_cast %59 : vector<1x8x128xf32> to vector<8x128xf32>
    %61 = vector.shape_cast %17 : vector<16x128xf32> to vector<2x8x128xf32>
    %cst_27 = arith.constant dense<0.000000e+00> : vector<8x128xf32>
    %62 = vector.multi_reduction <add>, %61, %cst_27 [0] : vector<2x8x128xf32> to vector<8x128xf32>
    %63 = arith.addf %60, %62 : vector<8x128xf32>
    %c1_28 = arith.constant 1 : index
    %c0_29 = arith.constant 0 : index
    %c0_30 = arith.constant 0 : index
    %64 = vector.load %arg5[%c1_28, %c0_29, %c0_30] : memref<4x8x128xf32, #tpu.memory_space<vmem>>, vector<1x8x128xf32>
    %65 = vector.shape_cast %64 : vector<1x8x128xf32> to vector<8x128xf32>
    %66 = vector.shape_cast %63 : vector<8x128xf32> to vector<1x8x128xf32>
    tpu.vector_store %arg5[%c1_28, %c0_29, %c0_30], %66 {strides = array<i32>} : memref<4x8x128xf32, #tpu.memory_space<vmem>>, vector<1x8x128xf32>,
    %c2 = arith.constant 2 : index
    %c0_31 = arith.constant 0 : index
    %c0_32 = arith.constant 0 : index
    %67 = vector.load %arg5[%c2, %c0_31, %c0_32] : memref<4x8x128xf32, #tpu.memory_space<vmem>>, vector<1x8x128xf32>
    %68 = vector.shape_cast %67 : vector<1x8x128xf32> to vector<8x128xf32>
    %69 = vector.shape_cast %4 : vector<16x128xf32> to vector<2x8x128xf32>
    %cst_33 = arith.constant dense<0.000000e+00> : vector<8x128xf32>
    %70 = vector.multi_reduction <add>, %69, %cst_33 [0] : vector<2x8x128xf32> to vector<8x128xf32>
    %71 = arith.addf %68, %70 : vector<8x128xf32>
    %c2_34 = arith.constant 2 : index
    %c0_35 = arith.constant 0 : index
    %c0_36 = arith.constant 0 : index
    %72 = vector.load %arg5[%c2_34, %c0_35, %c0_36] : memref<4x8x128xf32, #tpu.memory_space<vmem>>, vector<1x8x128xf32>
    %73 = vector.shape_cast %72 : vector<1x8x128xf32> to vector<8x128xf32>
    %74 = vector.shape_cast %71 : vector<8x128xf32> to vector<1x8x128xf32>
    tpu.vector_store %arg5[%c2_34, %c0_35, %c0_36], %74 {strides = array<i32>} : memref<4x8x128xf32, #tpu.memory_space<vmem>>, vector<1x8x128xf32>,
    %c3 = arith.constant 3 : index
    %c0_37 = arith.constant 0 : index
    %c0_38 = arith.constant 0 : index
    %75 = vector.load %arg5[%c3, %c0_37, %c0_38] : memref<4x8x128xf32, #tpu.memory_space<vmem>>, vector<1x8x128xf32>
    %76 = vector.shape_cast %75 : vector<1x8x128xf32> to vector<8x128xf32>
    %77 = vector.shape_cast %49 : vector<16x128xf32> to vector<2x8x128xf32>
    %cst_39 = arith.constant dense<0.000000e+00> : vector<8x128xf32>
    %78 = vector.multi_reduction <add>, %77, %cst_39 [0] : vector<2x8x128xf32> to vector<8x128xf32>
    %79 = arith.addf %76, %78 : vector<8x128xf32>
    %c3_40 = arith.constant 3 : index
    %c0_41 = arith.constant 0 : index
    %c0_42 = arith.constant 0 : index
    %80 = vector.load %arg5[%c3_40, %c0_41, %c0_42] : memref<4x8x128xf32, #tpu.memory_space<vmem>>, vector<1x8x128xf32>
    %81 = vector.shape_cast %80 : vector<1x8x128xf32> to vector<8x128xf32>
    %82 = vector.shape_cast %79 : vector<8x128xf32> to vector<1x8x128xf32>
    tpu.vector_store %arg5[%c3_40, %c0_41, %c0_42], %82 {strides = array<i32>} : memref<4x8x128xf32, #tpu.memory_space<vmem>>, vector<1x8x128xf32>,
    %c0_i32_43 = arith.constant 0 : i32
    %83 = arith.cmpi eq, %arg1, %c0_i32_43 : i32
    %84 = arith.extui %83 : i1 to i32
    %c0_i32_44 = arith.constant 0 : i32
    %85 = arith.cmpi ne, %84, %c0_i32_44 : i32
    scf.if %85 {
      %c0_45 = arith.constant 0 : index
      %c0_46 = arith.constant 0 : index
      %c0_47 = arith.constant 0 : index
      %86 = vector.load %arg5[%c0_45, %c0_46, %c0_47] : memref<4x8x128xf32, #tpu.memory_space<vmem>>, vector<4x8x128xf32>
      %c0_48 = arith.constant 0 : index
      %c0_49 = arith.constant 0 : index
      %c0_50 = arith.constant 0 : index
      %c0_51 = arith.constant 0 : index
      %87 = vector.load %arg4[%c0_48, %c0_49, %c0_50, %c0_51] : memref<1x4x8x128xf32, #tpu.memory_space<vmem>>, vector<1x4x8x128xf32>
      %88 = vector.shape_cast %87 : vector<1x4x8x128xf32> to vector<4x8x128xf32>
      %89 = vector.shape_cast %86 : vector<4x8x128xf32> to vector<1x4x8x128xf32>
      tpu.vector_store %arg4[%c0_48, %c0_49, %c0_50, %c0_51], %89 {strides = array<i32>} : memref<1x4x8x128xf32, #tpu.memory_space<vmem>>, vector<1x4x8x128xf32>,
    } else {
    }
    return
  }
  func.func @transform_0(%arg0: i32, %arg1: i32) -> (i32, i32) {
    %c1_i32 = arith.constant 1 : i32
    %0 = arith.muli %arg0, %c1_i32 : i32
    %1 = arith.addi %0, %arg1 : i32
    %c0_i32 = arith.constant 0 : i32
    %c0_i32_0 = arith.constant 0 : i32
    return %1, %c0_i32 : i32, i32
  }
  func.func @transform_1(%arg0: i32, %arg1: i32) -> (i32, i32) {
    %c1_i32 = arith.constant 1 : i32
    %0 = arith.muli %arg0, %c1_i32 : i32
    %1 = arith.addi %0, %arg1 : i32
    %c0_i32 = arith.constant 0 : i32
    %c0_i32_0 = arith.constant 0 : i32
    return %1, %c0_i32 : i32, i32
  }
  func.func @transform_2(%arg0: i32, %arg1: i32) -> (i32, i32, i32, i32) {
    %c0_i32 = arith.constant 0 : i32
    %c0_i32_0 = arith.constant 0 : i32
    %c0_i32_1 = arith.constant 0 : i32
    %c0_i32_2 = arith.constant 0 : i32
    return %arg0, %c0_i32, %c0_i32_0, %c0_i32_1 : i32, i32, i32, i32
  }
}

</mosaic_0001>

<bundles_post_ra>
// kernel: tpu_custom_call.1
= control target key start
LH: loop header
LB: loop body
LE: loop exit
PB: predicated region body
PF: predicated region fallthrough
CT: control target
= control target key end

     0   :  { %7 = vsyncpa [#allocation4], 0  ;;  %s364_s0 = inlined_call_operand.hbm [shape: f32[16,128], index: 0, kind: input, shape index: {}]   ;;  %s365_s1 = inlined_call_operand.hbm [shape: f32[16,128], index: 1, kind: input, shape index: {}]   ;;  %s366_s2 = inlined_call_operand.hbm [shape: f32[1,4,8,128], index: 2, kind: output, shape index: {}]  }
   0x1   :  { %8 = vsyncpa [#allocation7], 0 }
   0x2   :  { %9 = vsyncpa [#allocation5], 0  ;;  %s279_s9 = smov [#allocation3]   ;;  %s207_s13 = scalar_lea.hbm %s364_s0, 256 }
   0x3   :  { %s19_s10 = sshll.u32 %s279_s9, 4  ;;  %p208_p0 = scmp.ne.s32.totalorder %s364_s0, %s207_s13  ;;  %s20_s10 = int_to_ptr.vmem [resolvable:$true] %s19_s10 }
   0x4   :  { %p211_p1 = scmp.lt.u32.totalorder %s207_s13, %s364_s0 }
   0x6   :  { %p213_p2 = pnand %p211_p1, %p208_p0 }
   0x8   :  { %216 = shalt.err (!%p213_p2)
}
   0x9   :  { %s217_s18 = scalar_lea.vmem %s20_s10, 256  ;;  %p222_p4 = scmp.lt.s32.totalorder %s20_s10, %s20_s10 }
   0xa   :  { %p218_p3 = scmp.ne.s32.totalorder %s20_s10, %s217_s18  ;;  %p223_p5 = scmp.lt.s32.totalorder %s217_s18, %s217_s18 }
   0xc   :  { %p224_p6 = por %p223_p5, %p222_p4 }
   0xe   :  { %p225_p7 = pnand %p224_p6, %p218_p3 }
  0x10   :  { %228 = shalt.err (!%p225_p7)
}
  0x11   :  { %s280_s19 = smov 128   ;;  %s281_s20 = smov 8  }
  0x12   :  { %25 = dma.hbm_to_vmem [thread:$0]  %s364_s0, 256, %s20_s10, [#allocation4], %s280_s19, %s280_s19, %s281_s20  }
  0x13   :  { %s282_s23 = smov [#allocation6]   ;;  %s229_s27 = scalar_lea.hbm %s365_s1, 256 }
  0x14   :  { %s35_s24 = sshll.u32 %s282_s23, 4  ;;  %p230_p8 = scmp.ne.s32.totalorder %s365_s1, %s229_s27  ;;  %s36_s24 = int_to_ptr.vmem [resolvable:$true] %s35_s24 }
  0x15   :  { %p233_p9 = scmp.lt.u32.totalorder %s229_s27, %s365_s1 }
  0x17   :  { %p235_p10 = pnand %p233_p9, %p230_p8 }
  0x19   :  { %238 = shalt.err (!%p235_p10)
}
  0x1a   :  { %s239_s4 = scalar_lea.vmem %s36_s24, 256  ;;  %p244_p12 = scmp.lt.s32.totalorder %s36_s24, %s36_s24 }
  0x1b   :  { %p240_p11 = scmp.ne.s32.totalorder %s36_s24, %s239_s4  ;;  %p245_p13 = scmp.lt.s32.totalorder %s239_s4, %s239_s4 }
  0x1d   :  { %p246_p0 = por %p245_p13, %p244_p12 }
  0x1f   :  { %p247_p1 = pnand %p246_p0, %p240_p11 }
  0x21   :  { %250 = shalt.err (!%p247_p1)
}
  0x22   :  { %41 = dma.hbm_to_vmem [thread:$0]  %s365_s1, 256, %s36_s24, [#allocation7], %s280_s19, %s280_s19, %s281_s20  }
  0x23   :  { %273 = dma.done.wait [#allocation4], 256  }
  0x24   :  { %274 = vsyncadd [#allocation4], 4294967040 }
  0x25   :  { %275 = dma.done.wait [#allocation7], 256  }
  0x26   :  { %276 = vsyncadd [#allocation7], 4294967040  ;;  %v60_v0 = vld [vmem:[#allocation3] sm:$0xff]  ;;  %v329_v1 = vld [vmem:[#allocation3 + $0x8] sm:$0xff]  ;;  %s283_s1 = smov [#allocation8]  }
  0x27   :  { %v331_v2 = vld [vmem:[#allocation6] sm:$0xff]  ;;  %v333_v3 = vld [vmem:[#allocation6 + $0x8] sm:$0xff]  ;;  %v64_v4 = vand.u32 2147483647, %v60_v0  ;;  %v65_v5 = vand.u32 2147483647, %v329_v1 }
  0x28   :  { %v153_v6 = vadd.f32 %v333_v3, %v331_v2  ;;  %v108_v20 = vmax.f32 %v60_v0, 0.0  ;;  %v109_v22 = vmax.f32 %v329_v1, 0.0  ;;  %vm94_vm0 = vcmp.ge.f32.partialorder %v60_v0, 0.0  ;;  %s177_s6 = sshll.u32 %s283_s1, 4  ;;  %s178_s6 = int_to_ptr.vmem [resolvable:$true] %s177_s6 }
  0x29   :  { %v66_v7 = vsub.f32 0.0, %v64_v4  ;;  %v67_v8 = vsub.f32 0.0, %v65_v5  ;;  %vm95_vm1 = vcmp.ge.f32.partialorder %v329_v1, 0.0  ;;  %v128_v24 = vsub.f32 1.0, %v331_v2  ;;  %s251_s7 = scalar_lea.vmem %s178_s6, 512  ;;  %p256_p3 = scmp.lt.s32.totalorder %s178_s6, %s178_s6 }
  0x2a   :  { %170 = vst [vmem:[#allocation8 + $0x10] sm:$0xff] %v153_v6  ;;  %v129_v25 = vsub.f32 1.0, %v333_v3  ;;  %v100_v29 = vmin.f32 %v60_v0, 0.0  ;;  %v101_v30 = vmin.f32 %v329_v1, 0.0  ;;  %v110_v34 = vsub.f32 0.0, %v108_v20  ;;  %p252_p2 = scmp.ne.s32.totalorder %s178_s6, %s251_s7  ;;  %p257_p4 = scmp.lt.s32.totalorder %s251_s7, %s251_s7 }
  0x2b   :  { %v68_v9 = vmul.f32 1.442695, %v66_v7  ;;  %v70_v10 = vmul.f32 1.442695, %v67_v8  ;;  %v111_v38 = vsub.f32 0.0, %v109_v22 }
  0x2c   :  { %p258_p5 = por %p257_p4, %p256_p3 }
  0x2d   :  { %195 = vpow2.f32 %v68_v9 }
  0x2e   :  { %197 = vpow2.f32 %v70_v10  ;;  %p259_p6 = pnand %p258_p5, %p252_p2 }
  0x37   :  { %v196_v11 = vpop.eup %195 }
  0x38   :  { %v198_v12 = vpop.eup %197  ;;  %v72_v13 = vadd.f32 1.0, %v196_v11  ;;  %v75_v15 = vmul.f32 -0.5, %v196_v11  ;;  %v78_v18 = vand.u32 2147483647, %v196_v11 }
  0x39   :  { %v81_v14 = vadd.f32 1.0, %v198_v12  ;;  %v84_v16 = vmul.f32 -0.5, %v198_v12  ;;  %v87_v21 = vand.u32 2147483647, %v198_v12 }
  0x3a   :  { %199 = vrcp.f32 %v72_v13  ;;  %v76_v17 = vadd.f32 1.0, %v75_v15  ;;  %vm79_vm2 = vcmp.lt.f32.partialorder %v78_v18, 0.0004427343 }
  0x3b   :  { %201 = vrcp.f32 %v81_v14  ;;  %v85_v19 = vadd.f32 1.0, %v84_v16  ;;  %vm88_vm3 = vcmp.lt.f32.partialorder %v87_v21, 0.0004427343 }
  0x3c   :  { %203 = vlog2.f32 %v72_v13  ;;  %v77_v28 = vmul.f32 %v196_v11, %v76_v17 }
  0x3d   :  { %205 = vlog2.f32 %v81_v14  ;;  %v86_v33 = vmul.f32 %v198_v12, %v85_v19 }
  0x44   :  { %v200_v23 = vpop.eup %199 }
  0x45   :  { %v202_v26 = vpop.eup %201  ;;  %v96_v27 = vsub.f32 1.0, %v200_v23 }
  0x46   :  { %v204_v31 = vpop.eup %203  ;;  %v97_v32 = vsub.f32 1.0, %v202_v26 }
  0x47   :  { %v206_v35 = vpop.eup %205  ;;  %v98_v36 = vsel %vm94_vm0, %v200_v23, %v96_v27  ;;  %v74_v37 = vmul.f32 0.6931472, %v204_v31 }
  0x48   :  { %v99_v39 = vsel %vm95_vm1, %v202_v26, %v97_v32  ;;  %v126_v40 = vmul.f32 %v98_v36, %v331_v2  ;;  %v130_v41 = vsub.f32 1.0, %v98_v36  ;;  %v83_v42 = vmul.f32 0.6931472, %v206_v35 }
  0x49   :  { %v127_v43 = vmul.f32 %v99_v39, %v333_v3  ;;  %v131_v44 = vsub.f32 1.0, %v99_v39  ;;  %v148_v45 = vadd.f32 %v99_v39, %v98_v36  ;;  %v80_v46 = vsel %vm79_vm2, %v77_v28, %v74_v37 }
  0x4a   :  { %v132_v47 = vmul.f32 %v130_v41, %v128_v24  ;;  %v89_v48 = vsel %vm88_vm3, %v86_v33, %v83_v42  ;;  %v102_v49 = vsub.f32 %v100_v29, %v80_v46  ;;  %vm106_vm4 = vcmp.ge.f32.partialorder %v98_v36, 1.0 }
  0x4b   :  { %v133_v50 = vmul.f32 %v131_v44, %v129_v25  ;;  %v143_v51 = vadd.f32 %v127_v43, %v126_v40  ;;  %169 = vst [vmem:[#allocation8 + $0x8] sm:$0xff] %v148_v45  ;;  %v103_v52 = vsub.f32 %v101_v30, %v89_v48  ;;  %vm107_vm5 = vcmp.ge.f32.partialorder %v99_v39, 1.0 }
  0x4c   :  { %v112_v53 = vsub.f32 %v110_v34, %v80_v46  ;;  %v113_v54 = vsub.f32 %v111_v38, %v89_v48  ;;  %v134_v55 = vadd.f32 %v132_v47, %v126_v40  ;;  %v104_v57 = vmax.f32 %v102_v49, -100.0 }
  0x4d   :  { %v135_v56 = vadd.f32 %v133_v50, %v127_v43  ;;  %168 = vst [vmem:[#allocation8] sm:$0xff] %v143_v51  ;;  %v105_v58 = vmax.f32 %v103_v52, -100.0 }
  0x4e   :  { %v114_v59 = vmax.f32 %v112_v53, -100.0  ;;  %v115_v60 = vmax.f32 %v113_v54, -100.0  ;;  %v136_v1 = vsub.f32 1.0, %v134_v55 }
  0x4f   :  { %v137_v4 = vsub.f32 1.0, %v135_v56 }
  0x50   :  { %v116_v61 = vsel %vm106_vm4, -100.0, %v114_v59  ;;  %v117_v62 = vsel %vm107_vm5, -100.0, %v115_v60  ;;  %v138_v9 = vmul.f32 %v136_v1, %v136_v1 }
  0x51   :  { %v118_v63 = vsub.f32 %v104_v57, %v116_v61  ;;  %v119_v0 = vsub.f32 %v105_v58, %v117_v62  ;;  %v139_v10 = vmul.f32 %v137_v4, %v137_v4 }
  0x53   :  { %v120_v5 = vmul.f32 %v118_v63, %v331_v2  ;;  %v121_v6 = vmul.f32 %v119_v0, %v333_v3 }
  0x55   :  { %v122_v7 = vadd.f32 %v120_v5, %v116_v61  ;;  %v123_v8 = vadd.f32 %v121_v6, %v117_v62 }
  0x57   :  { %v124_v11 = vsub.f32 0.0, %v122_v7  ;;  %v125_v12 = vsub.f32 0.0, %v123_v8 }
  0x59   :  { %v140_v13 = vmul.f32 %v138_v9, %v124_v11  ;;  %v141_v14 = vmul.f32 %v139_v10, %v125_v12 }
  0x5b   :  { %v158_v15 = vadd.f32 %v141_v14, %v140_v13 }
  0x5d   :  { %171 = vst [vmem:[#allocation8 + $0x18] sm:$0xff] %v158_v15 }
  0x5e   :  { %262 = shalt.err (!%p259_p6)
}
  0x5f   :  { %s263_s10 = scalar_lea.hbm %s366_s2, 512 }
  0x60   :  { %p264_p7 = scmp.ne.s32.totalorder %s366_s2, %s263_s10  ;;  %p267_p8 = scmp.lt.u32.totalorder %s263_s10, %s366_s2 }
  0x62   :  { %p269_p9 = pnand %p267_p8, %p264_p7 }
  0x64   :  { %272 = shalt.err (!%p269_p9)
}
  0x65   :  { %183 = dma.vmem_to_hbm [thread:$0]  %s178_s6, 512, %s366_s2, [#allocation5], %s280_s19, %s280_s19, %s281_s20  }
  0x66   :  { %277 = dma.done.wait [#allocation5], 512  }
  0x67   :  { %278 = vsyncadd [#allocation5], 4294966784 }
  0x68   :  { %187 = vsyncpa [#allocation4], 1 }
  0x69   :  { %188 = vsyncpa [#allocation7], 1 }
  0x6a   :  { %189 = vsyncpa [#allocation5], 1 }

</bundles_post_ra>
